<compile_context>
chip_gen: v6e
topology: v6e:2x2x1
jax: 0.10.0
libtpu: 0.0.40
codegen_flags: <defaults>
</compile_context>

<pallas_src>
import functools

import jax
import jax.numpy as jnp
from jax.experimental import pallas as pl
from jax.experimental.pallas import tpu as pltpu


def _round_up(x, m):
    return (x + m - 1) // m * m


def _pad2(arr, rows, cols):
    r, c = arr.shape
    if r == rows and c == cols:
        return arr
    return jnp.pad(arr, ((0, rows - r), (0, cols - c)))


def _sage_agg_kernel(a_ref, y_ref, z_ref, d_ref, b_ref, o_ref, *scratch,
                     apply_relu):
    """Mean aggregation + epilogue for one SAGEConv layer.

    a_ref : (TM, TK)  int8  binary adjacency tile (dst x src, {0,1})
    y_ref : (TK, F)   bf16  pre-projected neighbor term  Y = X @ W_neigh
    z_ref : (TM, F)   f32   pre-projected self term      Z = X @ W_self
    d_ref : (TM, 1)   f32   1 / in-degree (mean normalizer)
    b_ref : (1, F)    f32   bias
    o_ref : (TM, F)         output tile
    scratch: () or (f32 (TM,F) accumulator,); if absent, accumulate in o_ref.
    """
    k = pl.program_id(1)
    acc = scratch[0] if scratch else o_ref

    @pl.when(k == 0)
    def _():
        acc[...] = jnp.zeros_like(acc)

    # A is stored as int8 purely to halve HBM traffic; cast to bf16 in VMEM.
    a = a_ref[...].astype(jnp.float32).astype(jnp.bfloat16)
    acc[...] += jnp.dot(a, y_ref[...], preferred_element_type=jnp.float32)

    @pl.when(k == pl.num_programs(1) - 1)
    def _():
        out = acc[...] * d_ref[...] + z_ref[...] + b_ref[...]   # f32 epilogue
        if apply_relu:
            out = jnp.maximum(out, 0.0)
        o_ref[...] = out.astype(o_ref.dtype)


def _pick_tiles(n_pad, fout, budget_bytes=12 * 1024 * 1024):
    """Largest lane/MXU-friendly tiles dividing n_pad within a VMEM budget.
    Keeps >= 2 row tiles when possible so v7x's two TensorCores both get work."""
    tm = 128
    for cand in (512, 256):
        if n_pad % cand == 0 and n_pad // cand >= 2:
            tm = cand
            break
    tk = 128
    for cand in (2048, 1024, 512, 256):
        if n_pad % cand != 0:
            continue
        need = (2 * tm * cand              # A tiles (int8), double buffered
                + 2 * cand * fout * 2      # Y tiles (bf16)
                + 2 * tm * fout * 4        # Z tile (f32)
                + 3 * tm * fout * 4)       # output + accumulator
        if need <= budget_bytes:
            tk = cand
            break
    return tm, tk


def sage_aggregate(a_i8, y_bf16, z_f32, inv_deg, bias, *, apply_relu, out_dtype):
    """out = (A @ Y) * inv_deg + Z + bias  (optionally relu), tiled over
    (dst-row tiles [parallel], src/K tiles [arbitrary])."""
    n_pad = a_i8.shape[0]
    fout = y_bf16.shape[1]
    tm, tk = _pick_tiles(n_pad, fout)
    grid = (n_pad // tm, n_pad // tk)

    acc_in_out = jnp.dtype(out_dtype) == jnp.dtype(jnp.float32)
    scratch_shapes = [] if acc_in_out else [pltpu.VMEM((tm, fout), jnp.float32)]
    kernel = functools.partial(_sage_agg_kernel, apply_relu=apply_relu)

    vmem_est = (2 * tm * tk                      # A (int8)
                + 2 * tk * fout * 2              # Y (bf16)
                + 2 * tm * fout * 4              # Z (f32)
                + 2 * tm * 4 + 2 * fout * 4      # inv_deg + bias
                + 2 * tm * fout * 4              # output
                + (0 if acc_in_out else tm * fout * 4))
    vmem_limit = int(min(48 * 1024 * 1024, max(32 * 1024 * 1024, 2 * vmem_est)))

    return pl.pallas_call(
        kernel,
        out_shape=jax.ShapeDtypeStruct((n_pad, fout), out_dtype),
        grid_spec=pltpu.PrefetchScalarGridSpec(
            num_scalar_prefetch=0,
            grid=grid,
            in_specs=[
                pl.BlockSpec((tm, tk), lambda i, k: (i, k)),     # A tile (int8)
                pl.BlockSpec((tk, fout), lambda i, k: (k, 0)),   # Y, K tile
                pl.BlockSpec((tm, fout), lambda i, k: (i, 0)),   # Z, row tile
                pl.BlockSpec((tm, 1), lambda i, k: (i, 0)),      # 1/deg
                pl.BlockSpec((1, fout), lambda i, k: (0, 0)),    # bias
            ],
            out_specs=pl.BlockSpec((tm, fout), lambda i, k: (i, 0)),
            scratch_shapes=scratch_shapes,
        ),
        compiler_params=pltpu.CompilerParams(
            dimension_semantics=("parallel", "arbitrary"),
            vmem_limit_bytes=vmem_limit,
        ),
    )(a_i8, y_bf16, z_f32, inv_deg, bias)


def graphsage_forward(adj, x, params):
    """GraphSAGE.forward: h = relu(conv1(g, x)); h = conv2(g, h).

    adj : (N, N) dense {0,1} adjacency, adj[dst, src] = 1 iff edge src->dst.
    """
    n = adj.shape[0]
    in_feats = x.shape[1]
    h_feats = params["w1_self"].shape[1]

    n_pad = _round_up(n, 128)
    fin_p = _round_up(in_feats, 128)
    fh_p = _round_up(h_feats, 128)

    adj_p = _pad2(adj.astype(jnp.float32), n_pad, n_pad)
    deg = adj_p.sum(axis=1, keepdims=True)
    inv_deg = (1.0 / jnp.maximum(deg, 1.0)).astype(jnp.float32)   # (n_pad, 1)
    a_i8 = adj_p.astype(jnp.int8)   # exact {0,1}; half the HBM bytes of bf16

    x_p = _pad2(x, n_pad, fin_p).astype(jnp.bfloat16)

    # Per-layer fused projection P = X @ [W_self | W_neigh]; 2*fout-wide output
    # fills the full MXU even at fout=128, and X is read once instead of twice.
    def project(xb, ws, wn, fin_pad, fout_pad):
        w_cat = jnp.concatenate(
            [_pad2(ws, fin_pad, fout_pad), _pad2(wn, fin_pad, fout_pad)], axis=1
        ).astype(jnp.bfloat16)
        p = jnp.dot(xb, w_cat, preferred_element_type=jnp.float32)
        z = p[:, :fout_pad]                        # f32 self term
        y = p[:, fout_pad:].astype(jnp.bfloat16)   # bf16 operand for A @ Y
        return z, y

    b1 = jnp.pad(params["b1"], (0, fh_p - h_feats)).reshape(1, fh_p).astype(jnp.float32)
    b2 = jnp.pad(params["b2"], (0, fh_p - h_feats)).reshape(1, fh_p).astype(jnp.float32)

    # Layer 1: relu(conv1); intermediate h stays padded + bf16 so layer 2's
    # projection consumes it directly (no re-pad / slice round-trip).
    z1, y1 = project(x_p, params["w1_self"], params["w1_neigh"], fin_p, fh_p)
    h_p = sage_aggregate(a_i8, y1, z1, inv_deg, b1,
                         apply_relu=True, out_dtype=jnp.bfloat16)

    # Layer 2: conv2 (no activation), f32 output accumulated directly in o_ref.
    # TODO(synk): for large sparse graphs replace the dense O(N^2) A stream with
    # a CSR scalar-prefetch gather kernel (PrefetchScalarGridSpec index_map
    # driven by neighbor offsets) -- A is the dominant byte stream here.
    z2, y2 = project(h_p, params["w2_self"], params["w2_neigh"], fh_p, fh_p)
    out_p = sage_aggregate(a_i8, y2, z2, inv_deg, b2,
                           apply_relu=False, out_dtype=jnp.float32)
    return out_p[:n, :h_feats]


def init_params(key, in_feats, h_feats):
    ks = jax.random.split(key, 4)
    s1 = 1.0 / jnp.sqrt(in_feats)
    s2 = 1.0 / jnp.sqrt(h_feats)
    return {
        "w1_self": jax.random.normal(ks[0], (in_feats, h_feats), jnp.float32) * s1,
        "w1_neigh": jax.random.normal(ks[1], (in_feats, h_feats), jnp.float32) * s1,
        "b1": jnp.zeros((h_feats,), jnp.float32),
        "w2_self": jax.random.normal(ks[2], (h_feats, h_feats), jnp.float32) * s2,
        "w2_neigh": jax.random.normal(ks[3], (h_feats, h_feats), jnp.float32) * s2,
        "b2": jnp.zeros((h_feats,), jnp.float32),
    }


def build_adjacency(n_nodes, key):
    """Dense binary adjacency (dst x src); every node gets >= 1 in-neighbor."""
    adj = (jax.random.uniform(key, (n_nodes, n_nodes)) < 0.25).astype(jnp.float32)
    adj = adj * (1.0 - jnp.eye(n_nodes, dtype=jnp.float32))  # no self loops
    ring = jnp.roll(jnp.eye(n_nodes, dtype=jnp.float32), 1, axis=1)
    return jnp.clip(adj + ring, 0.0, 1.0)


if __name__ == "__main__":
    N_NODES, IN_FEATS, H_FEATS = 16, 8, 32

    key = jax.random.PRNGKey(0)
    k_feat, k_adj, k_param = jax.random.split(key, 3)

    x = jax.random.normal(k_feat, (N_NODES, IN_FEATS), jnp.float32)
    adj = build_adjacency(N_NODES, k_adj)
    params = init_params(k_param, IN_FEATS, H_FEATS)

    out = graphsage_forward(adj, x, params)
    jax.block_until_ready(out)

    # Pure-JAX f32 reference of the same math; kernel uses bf16 MXU operands so
    # the comparison tolerance is loosened accordingly.
    deg = jnp.maximum(adj.sum(axis=1, keepdims=True), 1.0)
    a_norm = adj / deg

    def ref_layer(a, xx, ws, wn, b, relu):
        o = xx @ ws + (a @ xx) @ wn + b
        return jnp.maximum(o, 0.0) if relu else o

    ref = ref_layer(a_norm, x, params["w1_self"], params["w1_neigh"], params["b1"], True)
    ref = ref_layer(a_norm, ref, params["w2_self"], params["w2_neigh"], params["b2"], False)

    assert out.shape == (N_NODES, H_FEATS)
    max_err = jnp.max(jnp.abs(out - ref))
    assert jnp.allclose(out, ref, atol=1e-1, rtol=5e-2), f"max abs err {max_err}"

    print("KERNEL_OK")
</pallas_src>

<mosaic_0001>
module attributes {stable_mosaic.version = 11 : i64} {
  func.func @_sage_agg_kernel(%arg0: i32, %arg1: i32, %arg2: memref<128x128xi8, #tpu.memory_space<vmem>>, %arg3: memref<128x128xbf16, #tpu.memory_space<vmem>>, %arg4: memref<128x128xf32, #tpu.memory_space<vmem>>, %arg5: memref<128x1xf32, #tpu.memory_space<vmem>>, %arg6: memref<1x128xf32, #tpu.memory_space<vmem>>, %arg7: memref<128x128xbf16, #tpu.memory_space<vmem>>, %arg8: memref<128x128xf32, #tpu.memory_space<vmem>>) attributes {dimension_semantics = [#tpu.dimension_semantics<parallel>, #tpu.dimension_semantics<arbitrary>], iteration_bounds = array<i64: 1, 1>, scalar_prefetch = 0 : i64, scratch_operands = 1 : i64, tpu.core_type = #tpu.core_type<tc>, window_params = [{transform_indices = @transform_0, window_bounds = array<i64: 128, 128>}, {transform_indices = @transform_1, window_bounds = array<i64: 128, 128>}, {transform_indices = @transform_2, window_bounds = array<i64: 128, 128>}, {transform_indices = @transform_3, window_bounds = array<i64: 128, 1>}, {pipeline_mode = #tpu.pipeline_mode<synchronous>, transform_indices = @transform_4, window_bounds = array<i64: 1, 128>}, {transform_indices = @transform_5, window_bounds = array<i64: 128, 128>}]} {
    %c0_i32 = arith.constant 0 : i32
    %0 = arith.cmpi eq, %arg1, %c0_i32 : i32
    %1 = arith.extui %0 : i1 to i32
    %c0_i32_0 = arith.constant 0 : i32
    %2 = arith.cmpi ne, %1, %c0_i32_0 : i32
    scf.if %2 {
      %cst_10 = arith.constant 0.000000e+00 : f32
      %14 = vector.broadcast %cst_10 : f32 to vector<128x128xf32>
      %c0_11 = arith.constant 0 : index
      %c0_12 = arith.constant 0 : index
      %15 = vector.load %arg8[%c0_11, %c0_12] : memref<128x128xf32, #tpu.memory_space<vmem>>, vector<128x128xf32>
      tpu.vector_store %arg8[%c0_11, %c0_12], %14 {strides = array<i32>} : memref<128x128xf32, #tpu.memory_space<vmem>>, vector<128x128xf32>,
    } else {
    }
    %c0 = arith.constant 0 : index
    %c0_1 = arith.constant 0 : index
    %3 = vector.load %arg2[%c0, %c0_1] : memref<128x128xi8, #tpu.memory_space<vmem>>, vector<128x128xi8>
    %4 = arith.sitofp %3 : vector<128x128xi8> to vector<128x128xf32>
    %5 = arith.truncf %4 : vector<128x128xf32> to vector<128x128xbf16>
    %c0_2 = arith.constant 0 : index
    %c0_3 = arith.constant 0 : index
    %6 = vector.load %arg8[%c0_2, %c0_3] : memref<128x128xf32, #tpu.memory_space<vmem>>, vector<128x128xf32>
    %c0_4 = arith.constant 0 : index
    %c0_5 = arith.constant 0 : index
    %7 = vector.load %arg3[%c0_4, %c0_5] : memref<128x128xbf16, #tpu.memory_space<vmem>>, vector<128x128xbf16>
    %cst = arith.constant dense<0.000000e+00> : vector<128x128xf32>
    %8 = tpu.matmul %5, %7, %cst {dimension_numbers = #tpu.dot_dimension_numbers<[1], [0], [0], [1], [0, 0, 1, 1], [], []>} : vector<128x128xbf16>, vector<128x128xbf16>, vector<128x128xf32> -> vector<128x128xf32>
    %9 = arith.addf %6, %8 : vector<128x128xf32>
    %c0_6 = arith.constant 0 : index
    %c0_7 = arith.constant 0 : index
    %10 = vector.load %arg8[%c0_6, %c0_7] : memref<128x128xf32, #tpu.memory_space<vmem>>, vector<128x128xf32>
    tpu.vector_store %arg8[%c0_6, %c0_7], %9 {strides = array<i32>} : memref<128x128xf32, #tpu.memory_space<vmem>>, vector<128x128xf32>,
    %c0_i32_8 = arith.constant 0 : i32
    %11 = arith.cmpi eq, %arg1, %c0_i32_8 : i32
    %12 = arith.extui %11 : i1 to i32
    %c0_i32_9 = arith.constant 0 : i32
    %13 = arith.cmpi ne, %12, %c0_i32_9 : i32
    scf.if %13 {
      %c0_10 = arith.constant 0 : index
      %c0_11 = arith.constant 0 : index
      %14 = vector.load %arg8[%c0_10, %c0_11] : memref<128x128xf32, #tpu.memory_space<vmem>>, vector<128x128xf32>
      %c0_12 = arith.constant 0 : index
      %c0_13 = arith.constant 0 : index
      %15 = vector.load %arg5[%c0_12, %c0_13] : memref<128x1xf32, #tpu.memory_space<vmem>>, vector<128x1xf32>
      %16 = vector.broadcast %15 : vector<128x1xf32> to vector<128x128xf32>
      %17 = arith.mulf %14, %16 : vector<128x128xf32>
      %c0_14 = arith.constant 0 : index
      %c0_15 = arith.constant 0 : index
      %18 = vector.load %arg4[%c0_14, %c0_15] : memref<128x128xf32, #tpu.memory_space<vmem>>, vector<128x128xf32>
      %19 = arith.addf %17, %18 : vector<128x128xf32>
      %c0_16 = arith.constant 0 : index
      %c0_17 = arith.constant 0 : index
      %20 = vector.load %arg6[%c0_16, %c0_17] : memref<1x128xf32, #tpu.memory_space<vmem>>, vector<1x128xf32>
      %21 = vector.broadcast %20 : vector<1x128xf32> to vector<128x128xf32>
      %22 = arith.addf %19, %21 : vector<128x128xf32>
      %cst_18 = arith.constant 0.000000e+00 : f32
      %23 = vector.broadcast %cst_18 : f32 to vector<128x128xf32>
      %24 = arith.maximumf %22, %23 : vector<128x128xf32>
      %25 = arith.truncf %24 : vector<128x128xf32> to vector<128x128xbf16>
      %c0_19 = arith.constant 0 : index
      %c0_20 = arith.constant 0 : index
      %26 = vector.load %arg7[%c0_19, %c0_20] : memref<128x128xbf16, #tpu.memory_space<vmem>>, vector<128x128xbf16>
      tpu.vector_store %arg7[%c0_19, %c0_20], %25 {strides = array<i32>} : memref<128x128xbf16, #tpu.memory_space<vmem>>, vector<128x128xbf16>,
    } else {
    }
    return
  }
  func.func @transform_0(%arg0: i32, %arg1: i32) -> (i32, i32) {
    %c0_i32 = arith.constant 0 : i32
    return %arg0, %arg1 : i32, i32
  }
  func.func @transform_1(%arg0: i32, %arg1: i32) -> (i32, i32) {
    %c0_i32 = arith.constant 0 : i32
    %c0_i32_0 = arith.constant 0 : i32
    return %arg1, %c0_i32 : i32, i32
  }
  func.func @transform_2(%arg0: i32, %arg1: i32) -> (i32, i32) {
    %c0_i32 = arith.constant 0 : i32
    %c0_i32_0 = arith.constant 0 : i32
    return %arg0, %c0_i32 : i32, i32
  }
  func.func @transform_3(%arg0: i32, %arg1: i32) -> (i32, i32) {
    %c0_i32 = arith.constant 0 : i32
    %c0_i32_0 = arith.constant 0 : i32
    return %arg0, %c0_i32 : i32, i32
  }
  func.func @transform_4(%arg0: i32, %arg1: i32) -> (i32, i32) {
    %c0_i32 = arith.constant 0 : i32
    %c0_i32_0 = arith.constant 0 : i32
    %c0_i32_1 = arith.constant 0 : i32
    return %c0_i32, %c0_i32_0 : i32, i32
  }
  func.func @transform_5(%arg0: i32, %arg1: i32) -> (i32, i32) {
    %c0_i32 = arith.constant 0 : i32
    %c0_i32_0 = arith.constant 0 : i32
    return %arg0, %c0_i32 : i32, i32
  }
}

</mosaic_0001>

<bundles_post_ra>
// kernel: tpu_custom_call.1
= control target key start
LH: loop header
LB: loop body
LE: loop exit
PB: predicated region body
PF: predicated region fallthrough
CT: control target
= control target key end

     0   :  { %10 = vsyncpa [#allocation4], 0  ;;  %s1011_s0 = inlined_call_operand.hbm [shape: s8[128,128], index: 0, kind: input, shape index: {}]   ;;  %s1012_s1 = inlined_call_operand.hbm [shape: bf16[128,128], index: 1, kind: input, shape index: {}]   ;;  %s1013_s2 = inlined_call_operand.vmem [shape: f32[128,128], index: 2, kind: input, shape index: {}]   ;;  %s1014_s3 = inlined_call_operand.vmem [shape: f32[128,1], index: 3, kind: input, shape index: {}]   ;;  %s1015_s4 = inlined_call_operand.vmem [shape: f32[1,128], index: 4, kind: input, shape index: {}]   ;;  %s1016_s5 = inlined_call_operand.hbm [shape: bf16[128,128], index: 5, kind: output, shape index: {}]  }
   0x1   :  { %11 = vsyncpa [#allocation7], 0 }
   0x2   :  { %12 = vsyncpa [#allocation5], 0  ;;  %s827_s18 = smov [#allocation3]  }
   0x3   :  { %s18_s19 = sshll.u32 %s827_s18, 4  ;;  %s19_s19 = int_to_ptr.vmem [resolvable:$true] %s18_s19 }
   0x4   :  { %s769_s20 = scalar_lea.vmem %s19_s19, 512  ;;  %p774_p1 = scmp.lt.s32.totalorder %s19_s19, %s19_s19 }
   0x5   :  { %p770_p0 = scmp.ne.s32.totalorder %s19_s19, %s769_s20  ;;  %p775_p2 = scmp.lt.s32.totalorder %s769_s20, %s769_s20 }
   0x7   :  { %p776_p3 = por %p775_p2, %p774_p1 }
   0x9   :  { %p777_p4 = pnand %p776_p3, %p770_p0 }
   0xb   :  { %780 = shalt.err (!%p777_p4)
}
   0xc   :  { %s828_s21 = smov 128   ;;  %s829_s22 = smov 8  }
   0xd   :  { %24 = dma.hbm_to_vmem [thread:$0]  %s1011_s0, 512, %s19_s19, [#allocation4], %s828_s21, %s828_s21, %s829_s22  }
   0xe   :  { %s830_s25 = smov [#allocation6]  }
   0xf   :  { %s30_s26 = sshll.u32 %s830_s25, 4  ;;  %s31_s26 = int_to_ptr.vmem [resolvable:$true] %s30_s26 }
  0x10   :  { %s789_s27 = scalar_lea.vmem %s31_s26, 1024  ;;  %p794_p6 = scmp.lt.s32.totalorder %s31_s26, %s31_s26 }
  0x11   :  { %p790_p5 = scmp.ne.s32.totalorder %s31_s26, %s789_s27  ;;  %p795_p7 = scmp.lt.s32.totalorder %s789_s27, %s789_s27 }
  0x13   :  { %p796_p8 = por %p795_p7, %p794_p6 }
  0x15   :  { %p797_p9 = pnand %p796_p8, %p790_p5 }
  0x17   :  { %800 = shalt.err (!%p797_p9)
}
  0x18   :  { %s831_s28 = smov 64   ;;  %s832_s29 = smov 4  }
  0x19   :  { %36 = dma.hbm_to_vmem [thread:$0]  %s1012_s1, 1024, %s31_s26, [#allocation7], %s831_s28, %s831_s28, %s832_s29  }
  0x1a   :  { %821 = dma.done.wait [#allocation4], 512  }
  0x1b   :  { %822 = vsyncadd [#allocation4], 4294966784 }
  0x1c   :  { %823 = dma.done.wait [#allocation7], 1024  }
  0x1d   :  { %824 = vsyncadd [#allocation7], 4294966272  ;;  %v833_v0 = vmov 0   ;;  %v753_v1 = vld [vmem:[#allocation6 + $0x38] sm:$0xff]   ;;  %v754_v2 = vld [vmem:[#allocation6 + $0x30] sm:$0xff]  }
  0x1e   :  { %752 = vset.pattern.permute.xlu1 %v833_v0  ;;  %751 = vset.pattern.permute.xlu0 %v833_v0  ;;  %v755_v3 = vld [vmem:[#allocation6 + $0x28] sm:$0xff]   ;;  %v756_v4 = vld [vmem:[#allocation6 + $0x20] sm:$0xff]   ;;  %v876_v6 = vld [vmem:[#allocation3 + $0x10] sm:$0xff] }
  0x1f   :  { %695 = vmatprep.subr.bf16.mxu0 %v753_v1  ;;  %727 = vmatprep.subr.bf16.mxu1 %v753_v1  ;;  %v874_v5 = vld [vmem:[#allocation3] sm:$0xff]  ;;  %v78_v8 = vunpack.c.l.s8.bf16 %v876_v6  ;;  %v312_v9 = vld [vmem:[%s1014_s3 + $0x10] sm:$0xff]  ;;  %v313_v11 = vld [vmem:[%s1014_s3 + $0x18] sm:$0xff]  ;;  %v79_v28 = vunpack.c.h.s8.bf16 %v876_v6 }
  0x20   :  { %696 = vmatpush3.bf16.msra.mxu0 %v753_v1  ;;  %735 = vmatpush3.bf16.msra.mxu1 %v753_v1  ;;  %v74_v7 = vunpack.c.l.s8.bf16 %v874_v5  ;;  %v310_v10 = vld [vmem:[%s1014_s3] sm:$0xff]  ;;  %v311_v12 = vld [vmem:[%s1014_s3 + $0x8] sm:$0xff]  ;;  %v757_v13 = vld [vmem:[#allocation6 + $0x18] sm:$0xff]   ;;  %v75_v27 = vunpack.c.h.s8.bf16 %v874_v5 }
  0x21   :  { %697 = vmatprep.subr.bf16.mxu0 %v754_v2  ;;  %728 = vmatprep.subr.bf16.mxu1 %v754_v2  ;;  %v315_v14 = vld [vmem:[%s1014_s3 + $0x28] sm:$0xff]  ;;  %v314_v15 = vld [vmem:[%s1014_s3 + $0x20] sm:$0xff]  ;;  %v758_v16 = vld [vmem:[#allocation6 + $0x10] sm:$0xff]  }
  0x22   :  { %338 = vperm.xlu1 %752, %v312_v9   ;;  %328 = vperm.xlu0 %751, %v310_v10   ;;  %v317_v17 = vld [vmem:[%s1014_s3 + $0x38] sm:$0xff]  ;;  %v316_v18 = vld [vmem:[%s1014_s3 + $0x30] sm:$0xff]  ;;  %v759_v19 = vld [vmem:[#allocation6 + $0x8] sm:$0xff]  }
  0x23   :  { %711 = vmatprep.mubr.bf16.mxu0 %v74_v7  ;;  %719 = vmatprep.mubr.bf16.mxu1 %v78_v8  ;;  %v319_v20 = vld [vmem:[%s1014_s3 + $0x48] sm:$0xff]  ;;  %v318_v21 = vld [vmem:[%s1014_s3 + $0x40] sm:$0xff]  ;;  %v321_v23 = vld [vmem:[%s1014_s3 + $0x58] sm:$0xff] }
  0x24   :  { %698 = vmatpush3.bf16.msra.mxu0 %v754_v2  ;;  %736 = vmatpush3.bf16.msra.mxu1 %v754_v2  ;;  %v760_v22 = vld [vmem:[#allocation6] sm:$0xff]   ;;  %v320_v24 = vld [vmem:[%s1014_s3 + $0x50] sm:$0xff]  ;;  %v71_v25 = vld [vmem:[#allocation3 + $0x8] sm:$0xff] }
  0x25   :  { %699 = vmatprep.subr.bf16.mxu0 %v755_v3  ;;  %729 = vmatprep.subr.bf16.mxu1 %v755_v3  ;;  %v73_v26 = vld [vmem:[#allocation3 + $0x18] sm:$0xff]  ;;  %v76_v29 = vunpack.c.l.s8.bf16 %v71_v25  ;;  %v323_v31 = vld [vmem:[%s1014_s3 + $0x68] sm:$0xff]  ;;  %v322_v32 = vld [vmem:[%s1014_s3 + $0x60] sm:$0xff]  ;;  %v77_v35 = vunpack.c.h.s8.bf16 %v71_v25 }
  0x26   :  { %343 = vperm.xlu1 %752, %v313_v11   ;;  %333 = vperm.xlu0 %751, %v311_v12   ;;  %v80_v30 = vunpack.c.l.s8.bf16 %v73_v26  ;;  %v325_v33 = vld [vmem:[%s1014_s3 + $0x78] sm:$0xff]  ;;  %v324_v34 = vld [vmem:[%s1014_s3 + $0x70] sm:$0xff]  ;;  %v81_v36 = vunpack.c.h.s8.bf16 %v73_v26  ;;  %v422_v56 = vld [vmem:[%s1013_s2] sm:$0xff] }
  0x27   :  { %v424_v49 = vld [vmem:[%s1013_s2 + $0x10] sm:$0xff]  ;;  %v430_v58 = vld [vmem:[%s1013_s2 + $0x40] sm:$0xff]  ;;  %v425_v5 = vld [vmem:[%s1013_s2 + $0x18] sm:$0xff] }
  0x28   :  { %700 = vmatpush3.bf16.msra.mxu0 %v755_v3  ;;  %737 = vmatpush3.bf16.msra.mxu1 %v755_v3  ;;  %v432_v51 = vld [vmem:[%s1013_s2 + $0x50] sm:$0xff]  ;;  %v949_v0 = vld [vmem:[%s1015_s4] ss:$0 sm:$0xff]  ;;  %v433_v6 = vld [vmem:[%s1013_s2 + $0x58] sm:$0xff] }
  0x29   :  { %701 = vmatprep.subr.bf16.mxu0 %v756_v4  ;;  %730 = vmatprep.subr.bf16.mxu1 %v756_v4 }
  0x2a   :  { %353 = vperm.xlu1 %752, %v315_v14   ;;  %348 = vperm.xlu0 %751, %v314_v15   ;;  %v423_v14 = vld [vmem:[%s1013_s2 + $0x8] sm:$0xff] }
  0x2b   :  { %v431_v15 = vld [vmem:[%s1013_s2 + $0x48] sm:$0xff] }
  0x2c   :  { %702 = vmatpush3.bf16.msra.mxu0 %v756_v4  ;;  %738 = vmatpush3.bf16.msra.mxu1 %v756_v4 }
  0x2d   :  { %703 = vmatprep.subr.bf16.mxu0 %v757_v13  ;;  %731 = vmatprep.subr.bf16.mxu1 %v757_v13 }
  0x2e   :  { %363 = vperm.xlu1 %752, %v317_v17   ;;  %358 = vperm.xlu0 %751, %v316_v18  }
  0x30   :  { %704 = vmatpush3.bf16.msra.mxu0 %v757_v13  ;;  %739 = vmatpush3.bf16.msra.mxu1 %v757_v13 }
  0x31   :  { %705 = vmatprep.subr.bf16.mxu0 %v758_v16  ;;  %732 = vmatprep.subr.bf16.mxu1 %v758_v16 }
  0x32   :  { %373 = vperm.xlu1 %752, %v319_v20   ;;  %368 = vperm.xlu0 %751, %v318_v21  }
  0x34   :  { %706 = vmatpush3.bf16.msra.mxu0 %v758_v16  ;;  %740 = vmatpush3.bf16.msra.mxu1 %v758_v16 }
  0x35   :  { %707 = vmatprep.subr.bf16.mxu0 %v759_v19  ;;  %733 = vmatprep.subr.bf16.mxu1 %v759_v19 }
  0x36   :  { %383 = vperm.xlu1 %752, %v321_v23   ;;  %378 = vperm.xlu0 %751, %v320_v24  }
  0x38   :  { %708 = vmatpush3.bf16.msra.mxu0 %v759_v19  ;;  %741 = vmatpush3.bf16.msra.mxu1 %v759_v19 }
  0x39   :  { %709 = vmatprep.subr.bf16.mxu0 %v760_v22  ;;  %734 = vmatprep.subr.bf16.mxu1 %v760_v22 }
  0x3a   :  { %393 = vperm.xlu1 %752, %v323_v31   ;;  %388 = vperm.xlu0 %751, %v322_v32   ;;  %v428_v31 = vld [vmem:[%s1013_s2 + $0x30] sm:$0xff] }
  0x3b   :  { %v436_v32 = vld [vmem:[%s1013_s2 + $0x70] sm:$0xff] }
  0x3c   :  { %710 = vmatpush3.bf16.msra.mxu0 %v760_v22  ;;  %742 = vmatpush3.bf16.msra.mxu1 %v760_v22 }
  0x3e   :  { %403 = vperm.xlu1 %752, %v325_v33   ;;  %398 = vperm.xlu0 %751, %v324_v34  }
  0x3f   :  { %712 = vmatmul.mubr.bf16.vlgmr.msra.gmra.mxu0 %v75_v27  ;;  %720 = vmatmul.mubr.bf16.vlgmr.msra.gmra.mxu1 %v79_v28 }
  0x40   :  { %715 = vmatprep.mubr.bf16.mxu0 %v76_v29  ;;  %723 = vmatprep.mubr.bf16.mxu1 %v80_v30 }
  0x47   :  { %716 = vmatmul.mubr.bf16.gmra.mxu0 %v77_v35  ;;  %724 = vmatmul.mubr.bf16.gmra.mxu1 %v81_v36 }
  0x9d   :  { %v329_v37 = vpop.permute.xlu0 %328  ;;  %v339_v39 = vpop.permute.xlu1 %338 }
  0xa1   :  { %v334_v38 = vpop.permute.xlu0 %333  ;;  %v344_v41 = vpop.permute.xlu1 %343 }
  0xa5   :  { %v349_v40 = vpop.permute.xlu0 %348  ;;  %v930_v43 = vpop.permute.xlu1 %353 }
  0xa9   :  { %v359_v42 = vpop.permute.xlu0 %358  ;;  %v932_v45 = vpop.permute.xlu1 %363 }
  0xad   :  { %v369_v44 = vpop.permute.xlu0 %368  ;;  %v374_v47 = vpop.permute.xlu1 %373 }
  0xb1   :  { %v379_v46 = vpop.permute.xlu0 %378  ;;  %v384_v59 = vpop.permute.xlu1 %383 }
  0xb5   :  { %v389_v52 = vpop.permute.xlu0 %388  ;;  %v394_v22 = vpop.permute.xlu1 %393 }
  0xb9   :  { %v399_v11 = vpop.permute.xlu0 %398 }
  0xff   :  { %v713_v48 = vpop.f32.mrf.mxu0  ;;  %v721_v50 = vpop.f32.mrf.mxu1 }
 0x100   :  { %v408_v53 = vmul.f32 %v713_v48, %v339_v39  ;;  %v416_v54 = vmul.f32 %v721_v50, %v379_v46  ;;  %v426_v46 = vld [vmem:[%s1013_s2 + $0x20] sm:$0xff] }
 0x101   :  { %v196_v55 = vpop.f32.mrf.mxu0  ;;  %v228_v57 = vpop.f32.mrf.mxu1 }
 0x102   :  { %v440_v60 = vadd.f32 %v424_v49, %v408_v53  ;;  %v448_v61 = vadd.f32 %v432_v51, %v416_v54  ;;  %v406_v62 = vmul.f32 %v329_v37, %v196_v55  ;;  %v414_v63 = vmul.f32 %v369_v44, %v228_v57 }
 0x103   :  { %v714_v1 = vpop.f32.mrf.mxu0  ;;  %v722_v2 = vpop.f32.mrf.mxu1 }
 0x104   :  { %v438_v3 = vadd.f32 %v422_v56, %v406_v62  ;;  %v446_v4 = vadd.f32 %v430_v58, %v414_v63  ;;  %v409_v7 = vmul.f32 %v714_v1, %v344_v41  ;;  %v417_v8 = vmul.f32 %v722_v2, %v384_v59  ;;  %v404_v59 = vpop.permute.xlu1 %403  ;;  %v429_v62 = vld [vmem:[%s1013_s2 + $0x38] sm:$0xff] }
 0x105   :  { %v199_v9 = vpop.f32.mrf.mxu0  ;;  %v231_v10 = vpop.f32.mrf.mxu1  ;;  %v463_v12 = vadd.f32 %v949_v0, %v440_v60  ;;  %v471_v13 = vadd.f32 %v949_v0, %v448_v61  ;;  %v437_v63 = vld [vmem:[%s1013_s2 + $0x78] sm:$0xff] }
 0x106   :  { %v441_v16 = vadd.f32 %v425_v5, %v409_v7  ;;  %v449_v17 = vadd.f32 %v433_v6, %v417_v8  ;;  %v407_v18 = vmul.f32 %v334_v38, %v199_v9  ;;  %v415_v19 = vmul.f32 %v374_v47, %v231_v10  ;;  %v434_v47 = vld [vmem:[%s1013_s2 + $0x60] sm:$0xff]  ;;  %v427_v5 = vld [vmem:[%s1013_s2 + $0x28] sm:$0xff] }
 0x107   :  { %v717_v20 = vpop.f32.mrf.mxu0  ;;  %v725_v21 = vpop.f32.mrf.mxu1  ;;  %v461_v23 = vadd.f32 %v949_v0, %v438_v3  ;;  %v469_v24 = vadd.f32 %v949_v0, %v446_v4  ;;  %v479_v35 = vmax.f32 %v463_v12, 0.0  ;;  %v487_v36 = vmax.f32 %v471_v13, 0.0  ;;  %v435_v6 = vld [vmem:[%s1013_s2 + $0x68] sm:$0xff]  ;;  %s834_s2 = smov [#allocation8]  }
 0x108   :  { %v412_v25 = vmul.f32 %v717_v20, %v359_v42  ;;  %v420_v26 = vmul.f32 %v725_v21, %v399_v11  ;;  %v464_v27 = vadd.f32 %v949_v0, %v441_v16  ;;  %v472_v28 = vadd.f32 %v949_v0, %v449_v17  ;;  %s578_s18 = sshll.u32 %s834_s2, 4  ;;  %s579_s18 = int_to_ptr.vmem [resolvable:$true] %s578_s18 }
 0x109   :  { %v439_v29 = vadd.f32 %v423_v14, %v407_v18  ;;  %v447_v30 = vadd.f32 %v431_v15, %v415_v19  ;;  %v212_v33 = vpop.f32.mrf.mxu0  ;;  %v244_v34 = vpop.f32.mrf.mxu1  ;;  %v477_v50 = vmax.f32 %v461_v23, 0.0  ;;  %v485_v51 = vmax.f32 %v469_v24, 0.0  ;;  %s801_s19 = scalar_lea.vmem %s579_s18, 1024  ;;  %p806_p11 = scmp.lt.s32.totalorder %s579_s18, %s579_s18 }
 0x10a   :  { %v410_v37 = vmul.f32 %v349_v40, %v212_v33  ;;  %v418_v38 = vmul.f32 %v389_v52, %v244_v34  ;;  %v480_v39 = vmax.f32 %v464_v27, 0.0  ;;  %v488_v41 = vmax.f32 %v472_v28, 0.0  ;;  %p802_p10 = scmp.ne.s32.totalorder %s579_s18, %s801_s19  ;;  %p807_p12 = scmp.lt.s32.totalorder %s801_s19, %s801_s19 }
 0x10b   :  { %v462_v42 = vadd.f32 %v949_v0, %v439_v29  ;;  %v470_v44 = vadd.f32 %v949_v0, %v447_v30  ;;  %v718_v48 = vpop.f32.mrf.mxu0  ;;  %v726_v49 = vpop.f32.mrf.mxu1  ;;  %v444_v40 = vadd.f32 %v428_v31, %v412_v25  ;;  %v452_v52 = vadd.f32 %v436_v32, %v420_v26 }
 0x10c   :  { %v640_v53 = vpack.c.bf16 %v480_v39, %v479_v35  ;;  %v660_v54 = vpack.c.bf16 %v488_v41, %v487_v36  ;;  %v442_v60 = vadd.f32 %v426_v46, %v410_v37  ;;  %v450_v61 = vadd.f32 %v434_v47, %v418_v38  ;;  %p808_p13 = por %p807_p12, %p806_p11 }
 0x10d   :  { %v478_v55 = vmax.f32 %v462_v42, 0.0  ;;  %v486_v56 = vmax.f32 %v470_v44, 0.0  ;;  %v215_v57 = vpop.f32.mrf.mxu0  ;;  %v247_v58 = vpop.f32.mrf.mxu1  ;;  %v413_v3 = vmul.f32 %v718_v48, %v932_v45  ;;  %v421_v4 = vmul.f32 %v726_v49, %v404_v59 }
 0x10e   :  { %672 = vst [vmem:[#allocation8 + $0x8] sm:$0xff] %v640_v53   ;;  %676 = vst [vmem:[#allocation8 + $0x28] sm:$0xff] %v660_v54   ;;  %v411_v7 = vmul.f32 %v930_v43, %v215_v57  ;;  %v419_v8 = vmul.f32 %v394_v22, %v247_v58  ;;  %v467_v9 = vadd.f32 %v949_v0, %v444_v40  ;;  %p809_p0 = pnand %p808_p13, %p802_p10 }
 0x10f   :  { %v635_v1 = vpack.c.bf16 %v478_v55, %v477_v50  ;;  %v655_v2 = vpack.c.bf16 %v486_v56, %v485_v51  ;;  %v475_v10 = vadd.f32 %v949_v0, %v452_v52  ;;  %v445_v11 = vadd.f32 %v429_v62, %v413_v3 }
 0x110   :  { %v453_v45 = vadd.f32 %v437_v63, %v421_v4  ;;  %v465_v12 = vadd.f32 %v949_v0, %v442_v60  ;;  %v473_v13 = vadd.f32 %v949_v0, %v450_v61  ;;  %v443_v14 = vadd.f32 %v427_v5, %v411_v7 }
 0x111   :  { %636 = vst [vmem:[#allocation8] sm:$0xff] %v635_v1   ;;  %675 = vst [vmem:[#allocation8 + $0x20] sm:$0xff] %v655_v2   ;;  %v451_v15 = vadd.f32 %v435_v6, %v419_v8  ;;  %v468_v16 = vadd.f32 %v949_v0, %v445_v11  ;;  %v483_v19 = vmax.f32 %v467_v9, 0.0  ;;  %v491_v20 = vmax.f32 %v475_v10, 0.0 }
 0x112   :  { %v476_v17 = vadd.f32 %v949_v0, %v453_v45  ;;  %v466_v43 = vadd.f32 %v949_v0, %v443_v14  ;;  %v481_v23 = vmax.f32 %v465_v12, 0.0  ;;  %v489_v24 = vmax.f32 %v473_v13, 0.0 }
 0x113   :  { %v474_v18 = vadd.f32 %v949_v0, %v451_v15  ;;  %v484_v21 = vmax.f32 %v468_v16, 0.0 }
 0x114   :  { %v492_v22 = vmax.f32 %v476_v17, 0.0  ;;  %v482_v25 = vmax.f32 %v466_v43, 0.0 }
 0x115   :  { %v490_v26 = vmax.f32 %v474_v18, 0.0  ;;  %v650_v27 = vpack.c.bf16 %v484_v21, %v483_v19 }
 0x116   :  { %v670_v28 = vpack.c.bf16 %v492_v22, %v491_v20  ;;  %v645_v29 = vpack.c.bf16 %v482_v25, %v481_v23 }
 0x117   :  { %v665_v30 = vpack.c.bf16 %v490_v26, %v489_v24  ;;  %674 = vst [vmem:[#allocation8 + $0x18] sm:$0xff] %v650_v27  }
 0x118   :  { %678 = vst [vmem:[#allocation8 + $0x38] sm:$0xff] %v670_v28   ;;  %673 = vst [vmem:[#allocation8 + $0x10] sm:$0xff] %v645_v29  }
 0x119   :  { %677 = vst [vmem:[#allocation8 + $0x30] sm:$0xff] %v665_v30  }
 0x11a   :  { %812 = shalt.err (!%p809_p0)
}
 0x11b   :  { %584 = dma.vmem_to_hbm [thread:$0]  %s579_s18, 1024, %s1016_s5, [#allocation5], %s831_s28, %s831_s28, %s832_s29  }
 0x11c   :  { %825 = dma.done.wait [#allocation5], 1024  }
 0x11d   :  { %826 = vsyncadd [#allocation5], 4294966272 }
 0x11e   :  { %588 = vsyncpa [#allocation4], 1 }
 0x11f   :  { %589 = vsyncpa [#allocation7], 1 }
 0x120   :  { %590 = vsyncpa [#allocation5], 1 }

</bundles_post_ra>
